<compile_context>
chip_gen: v7x
topology: tpu7x:2x2x1
jax: 0.10.0
libtpu: 0.0.40
codegen_flags: <defaults>
</compile_context>

<pallas_src>
import functools

import jax
import jax.numpy as jnp
from jax.experimental import pallas as pl
from jax.experimental.pallas import tpu as pltpu


def _counter_loss_kernel(ind_ref, pos_ref, shuf_ind_ref, shuf_pos_ref, out_ref, *, beta):
    """Elementwise hot path on one (TB, TC) tile."""
    ind = ind_ref[...].astype(jnp.float32)            # (TB, TC)
    pos = pos_ref[...].astype(jnp.float32)            # (TB, TC)
    shuf_ind = shuf_ind_ref[...].astype(jnp.float32)  # (TB, 1) broadcasts over concepts
    shuf_pos = shuf_pos_ref[...].astype(jnp.float32)  # (TB, 1)

    # img_only_feats = relu(indicator - shuffled_indicator)
    iof = jnp.maximum(ind - shuf_ind, 0.0)
    # relu(shuf_pos*iof - pos*iof + beta) * iof == relu((shuf_pos - pos)*iof + beta) * iof
    out = jnp.maximum((shuf_pos - pos) * iof + beta, 0.0) * iof
    out_ref[...] = out.astype(out_ref.dtype)


def _round_up(x, m):
    return ((x + m - 1) // m) * m


def _counter_loss_ref(indicator_vectors, positive, perm, beta):
    """Pure-JAX reference mirroring the PyTorch forward exactly."""
    sp = positive[perm, 0][:, None]
    si = indicator_vectors[perm, 0][:, None]
    iof = jnp.maximum(indicator_vectors - si, 0.0)
    return jnp.maximum(sp * iof - positive * iof + beta, 0.0) * iof


def counter_loss(indicator_vectors, positive, perm, beta, *,
                 tb=512, tc=2048, force_pallas=False):
    """Row-permutation gather (two tiny (B,1) vectors) stays in plain JAX; the
    full (B,C) elementwise compute streams through a tiled Pallas kernel."""
    B, C = positive.shape
    out_dtype = positive.dtype

    # torch.gather(x, 0, perm.unsqueeze(-1)) == x[perm, 0][:, None]
    shuffled_positive = positive[perm, 0][:, None]
    shuffled_indicator = indicator_vectors[perm, 0][:, None]

    # ---- tile selection (lane-dense block shapes; raggedness handled by Pallas) ----
    TB = min(int(tb), _round_up(B, 8))       # multiple of 8  (sublane)
    TC = min(int(tc), _round_up(C, 128))     # multiple of 128 (lane)
    grid = (pl.cdiv(B, TB), pl.cdiv(C, TC))

    if grid == (1, 1) and not force_pallas:
        # Single-block pallas_call has no DMA/compute overlap; XLA fusion is as fast.
        ind32 = indicator_vectors.astype(jnp.float32)
        pos32 = positive.astype(jnp.float32)
        iof = jnp.maximum(ind32 - shuffled_indicator.astype(jnp.float32), 0.0)
        out = jnp.maximum(
            (shuffled_positive.astype(jnp.float32) - pos32) * iof + beta, 0.0) * iof
        return out.astype(out_dtype)

    kernel = functools.partial(_counter_loss_kernel, beta=float(beta))

    return pl.pallas_call(
        kernel,
        out_shape=jax.ShapeDtypeStruct((B, C), out_dtype),
        grid=grid,
        in_specs=[
            pl.BlockSpec((TB, TC), lambda i, j: (i, j)),
            pl.BlockSpec((TB, TC), lambda i, j: (i, j)),
            pl.BlockSpec((TB, 1), lambda i, j: (i, 0)),   # revisit-skipped across j
            pl.BlockSpec((TB, 1), lambda i, j: (i, 0)),
        ],
        out_specs=pl.BlockSpec((TB, TC), lambda i, j: (i, j)),
        compiler_params=pltpu.CompilerParams(
            dimension_semantics=("parallel", "parallel"),
            # Large double-buffered blocks (~25 MiB f32 worst case) need more than
            # v5e's 16 MiB default scoped VMEM; 40 MiB still fits v7x's 64 MiB.
            vmem_limit_bytes=40 << 20,
        ),
    )(indicator_vectors, positive, shuffled_indicator, shuffled_positive)


if __name__ == "__main__":
    key = jax.random.PRNGKey(0)
    beta = 0.1

    # ---- test 1: the module's natural small shape, forced through the kernel ----
    k1, k2, k3, key = jax.random.split(key, 4)
    B, C = 8, 128  # (batch_size, num_concepts)
    indicator_vectors = (jax.random.uniform(k1, (B, C)) > 0.5).astype(jnp.float32)
    positive = jax.random.uniform(k2, (B, C), dtype=jnp.float32)
    perm = jax.random.permutation(k3, B)

    out = counter_loss(indicator_vectors, positive, perm, beta, force_pallas=True)
    out = jax.block_until_ready(out)
    ref = _counter_loss_ref(indicator_vectors, positive, perm, beta)
    assert out.shape == (B, C)
    assert jnp.allclose(out, ref, atol=1e-6), "kernel mismatch vs reference (test 1)"

    # ---- test 2: multi-step grid with ragged boundary blocks on both axes ----
    k1, k2, k3, key = jax.random.split(key, 4)
    B2, C2 = 50, 300
    ind2 = (jax.random.uniform(k1, (B2, C2)) > 0.5).astype(jnp.float32)
    pos2 = jax.random.uniform(k2, (B2, C2), dtype=jnp.float32)
    perm2 = jax.random.permutation(k3, B2)

    out2 = counter_loss(ind2, pos2, perm2, beta, tb=16, tc=128, force_pallas=True)
    out2 = jax.block_until_ready(out2)
    ref2 = _counter_loss_ref(ind2, pos2, perm2, beta)
    assert out2.shape == (B2, C2)
    assert jnp.allclose(out2, ref2, atol=1e-6), "kernel mismatch vs reference (test 2)"

    print("KERNEL_OK")
</pallas_src>

<mosaic_0001>
module attributes {stable_mosaic.version = 11 : i64} {
  func.func @_counter_loss_kernel(%arg0: i32, %arg1: i32, %arg2: memref<8x128xf32, #tpu.memory_space<vmem>>, %arg3: memref<8x128xf32, #tpu.memory_space<vmem>>, %arg4: memref<8x1xf32, #tpu.memory_space<vmem>>, %arg5: memref<8x1xf32, #tpu.memory_space<vmem>>, %arg6: memref<8x128xf32, #tpu.memory_space<vmem>>) attributes {dimension_semantics = [#tpu.dimension_semantics<parallel>, #tpu.dimension_semantics<parallel>], iteration_bounds = array<i64: 1, 1>, scalar_prefetch = 0 : i64, scratch_operands = 0 : i64, tpu.core_type = #tpu.core_type<tc>, window_params = [{transform_indices = @transform_0, window_bounds = array<i64: 8, 128>}, {transform_indices = @transform_1, window_bounds = array<i64: 8, 128>}, {transform_indices = @transform_2, window_bounds = array<i64: 8, 1>}, {transform_indices = @transform_3, window_bounds = array<i64: 8, 1>}, {transform_indices = @transform_4, window_bounds = array<i64: 8, 128>}]} {
    %c0 = arith.constant 0 : index
    %c0_0 = arith.constant 0 : index
    %0 = vector.load %arg2[%c0, %c0_0] : memref<8x128xf32, #tpu.memory_space<vmem>>, vector<8x128xf32>
    %c0_1 = arith.constant 0 : index
    %c0_2 = arith.constant 0 : index
    %1 = vector.load %arg3[%c0_1, %c0_2] : memref<8x128xf32, #tpu.memory_space<vmem>>, vector<8x128xf32>
    %c0_3 = arith.constant 0 : index
    %c0_4 = arith.constant 0 : index
    %2 = vector.load %arg4[%c0_3, %c0_4] : memref<8x1xf32, #tpu.memory_space<vmem>>, vector<8x1xf32>
    %c0_5 = arith.constant 0 : index
    %c0_6 = arith.constant 0 : index
    %3 = vector.load %arg5[%c0_5, %c0_6] : memref<8x1xf32, #tpu.memory_space<vmem>>, vector<8x1xf32>
    %4 = vector.broadcast %2 : vector<8x1xf32> to vector<8x128xf32>
    %5 = arith.subf %0, %4 : vector<8x128xf32>
    %cst = arith.constant 0.000000e+00 : f32
    %6 = vector.broadcast %cst : f32 to vector<8x128xf32>
    %7 = arith.maximumf %5, %6 : vector<8x128xf32>
    %8 = vector.broadcast %3 : vector<8x1xf32> to vector<8x128xf32>
    %9 = arith.subf %8, %1 : vector<8x128xf32>
    %10 = arith.mulf %9, %7 : vector<8x128xf32>
    %cst_7 = arith.constant 1.000000e-01 : f32
    %11 = vector.broadcast %cst_7 : f32 to vector<8x128xf32>
    %12 = arith.addf %10, %11 : vector<8x128xf32>
    %cst_8 = arith.constant 0.000000e+00 : f32
    %13 = vector.broadcast %cst_8 : f32 to vector<8x128xf32>
    %14 = arith.maximumf %12, %13 : vector<8x128xf32>
    %15 = arith.mulf %14, %7 : vector<8x128xf32>
    %c0_9 = arith.constant 0 : index
    %c0_10 = arith.constant 0 : index
    %16 = vector.load %arg6[%c0_9, %c0_10] : memref<8x128xf32, #tpu.memory_space<vmem>>, vector<8x128xf32>
    tpu.vector_store %arg6[%c0_9, %c0_10], %15 {strides = array<i32>} : memref<8x128xf32, #tpu.memory_space<vmem>>, vector<8x128xf32>,
    return
  }
  func.func @transform_0(%arg0: i32, %arg1: i32) -> (i32, i32) {
    %c0_i32 = arith.constant 0 : i32
    return %arg0, %arg1 : i32, i32
  }
  func.func @transform_1(%arg0: i32, %arg1: i32) -> (i32, i32) {
    %c0_i32 = arith.constant 0 : i32
    return %arg0, %arg1 : i32, i32
  }
  func.func @transform_2(%arg0: i32, %arg1: i32) -> (i32, i32) {
    %c0_i32 = arith.constant 0 : i32
    %c0_i32_0 = arith.constant 0 : i32
    return %arg0, %c0_i32 : i32, i32
  }
  func.func @transform_3(%arg0: i32, %arg1: i32) -> (i32, i32) {
    %c0_i32 = arith.constant 0 : i32
    %c0_i32_0 = arith.constant 0 : i32
    return %arg0, %c0_i32 : i32, i32
  }
  func.func @transform_4(%arg0: i32, %arg1: i32) -> (i32, i32) {
    %c0_i32 = arith.constant 0 : i32
    return %arg0, %arg1 : i32, i32
  }
}

</mosaic_0001>

<bundles_post_ra>
// kernel: tpu_custom_call.1
= control target key start
LH: loop header
LB: loop body
LE: loop exit
PB: predicated region body
PF: predicated region fallthrough
CT: control target
= control target key end

     0   :  { %s132_s0 = inlined_call_operand.vmem [shape: f32[8,128], index: 0, kind: input, shape index: {}]   ;;  %s133_s1 = inlined_call_operand.vmem [shape: f32[8,128], index: 1, kind: input, shape index: {}]   ;;  %s134_s2 = inlined_call_operand.vmem [shape: f32[8,1], index: 2, kind: input, shape index: {}]   ;;  %s135_s3 = inlined_call_operand.vmem [shape: f32[8,1], index: 3, kind: input, shape index: {}]   ;;  %s136_s4 = inlined_call_operand.hbm [shape: f32[8,128], index: 4, kind: output, shape index: {}]  }
   0x1   :  { %v20_v0 = vld [vmem:[%s134_s2] sm:$0xff] }
   0x2   :  { %9 = vsyncpa [#allocation3], 0  ;;  %v81_v1 = vmov 0   ;;  %v21_v2 = vld [vmem:[%s135_s3] sm:$0xff]  ;;  %s82_s2 = smov [#allocation2]  }
   0x3   :  { %56 = vset.pattern.permute.xlu0 %v81_v1  ;;  %v18_v3 = vld [vmem:[%s132_s0] sm:$0xff]  ;;  %s46_s23 = sshll.u32 %s82_s2, 4  ;;  %s47_s23 = int_to_ptr.vmem [resolvable:$true] %s46_s23 }
   0x4   :  { %24 = vperm.xlu0 %56, %v20_v0   ;;  %v19_v6 = vld [vmem:[%s133_s1] sm:$0xff]  ;;  %s57_s3 = scalar_lea.vmem %s47_s23, 128  ;;  %p62_p1 = scmp.lt.s32.totalorder %s47_s23, %s47_s23 }
   0x5   :  { %p58_p0 = scmp.ne.s32.totalorder %s47_s23, %s57_s3  ;;  %p63_p2 = scmp.lt.s32.totalorder %s57_s3, %s57_s3 }
   0x7   :  { %p64_p3 = por %p63_p2, %p62_p1 }
   0x8   :  { %31 = vperm.xlu0 %56, %v21_v2  }
   0x9   :  { %p65_p4 = pnand %p64_p3, %p58_p0 }
  0x83   :  { %v25_v4 = vpop.permute.xlu0 %24 }
  0x84   :  { %v27_v5 = vsub.f32 %v18_v3, %v25_v4 }
  0x86   :  { %v28_v8 = vmax.f32 %v27_v5, 0.0 }
  0x87   :  { %v32_v7 = vpop.permute.xlu0 %31 }
  0x88   :  { %v34_v9 = vsub.f32 %v32_v7, %v19_v6 }
  0x8a   :  { %v35_v10 = vmul.f32 %v34_v9, %v28_v8 }
  0x8c   :  { %v36_v11 = vadd.f32 0.1, %v35_v10 }
  0x8e   :  { %v37_v12 = vmax.f32 %v36_v11, 0.0 }
  0x90   :  { %v38_v13 = vmul.f32 %v37_v12, %v28_v8 }
  0x92   :  { %39 = vst [vmem:[#allocation2] sm:$0xff] %v38_v13 }
  0x93   :  { %68 = shalt.err (!%p65_p4)
}
  0x94   :  { %s69_s24 = scalar_lea.hbm %s136_s4, 128 }
  0x95   :  { %p70_p5 = scmp.ne.s32.totalorder %s136_s4, %s69_s24  ;;  %p73_p6 = scmp.lt.u32.totalorder %s69_s24, %s136_s4 }
  0x97   :  { %p75_p7 = pnand %p73_p6, %p70_p5 }
  0x99   :  { %78 = shalt.err (!%p75_p7)
}
  0x9a   :  { %49 = dma.vmem_to_hbm [thread:$0]  %s47_s23, 128, %s136_s4, [#allocation3]  }
  0x9b   :  { %79 = dma.done.wait [#allocation3], 128  }
  0x9c   :  { %80 = vsyncadd [#allocation3], 4294967168 }
  0x9d   :  { %53 = vsyncpa [#allocation3], 1 }

</bundles_post_ra>
